<compile_context>
chip_gen: v5e
topology: v5e:2x2
jax: 0.10.0
libtpu: 0.0.40
codegen_flags: <defaults>
</compile_context>

<pallas_src>
import functools

import jax
import jax.numpy as jnp
from jax.experimental import pallas as pl
from jax.experimental.pallas import tpu as pltpu


def _round_up(x: int, m: int) -> int:
    return (x + m - 1) // m * m


# ----------------------------------------------------------------------------
# Fused SmoothL1 kernel: all heads in one pallas_call, num_cats scalar outputs
# ----------------------------------------------------------------------------
def _fused_smooth_l1_kernel(
    cat_ref,    # SMEM int32 (n_tiles,) : category id of this tile (0/1/2)
    scale_ref,  # SMEM f32   (n_tiles,) : 1/numel of the head this tile belongs to
    beta_ref,   # SMEM f32   (n_tiles,) : SmoothL1 beta for this tile
    hob_ref,    # SMEM f32   (n_tiles,) : 0.5/beta (divide hoisted)
    pred_ref,   # VMEM f32   (TILE_R, 128)
    tgt_ref,    # VMEM f32   (TILE_R, 128)
    out_ref,    # SMEM f32   (num_cats,) : per-category summed mean-SmoothL1
    acc_ref,    # VMEM f32   (num_cats, TILE_R, 128) accumulator scratch
    *,
    num_cats: int,
):
    i = pl.program_id(0)

    @pl.when(i == 0)
    def _init():
        acc_ref[...] = jnp.zeros_like(acc_ref)

    beta = beta_ref[i]
    hob = hob_ref[i]
    scale = scale_ref[i]

    d = pred_ref[...] - tgt_ref[...]
    ad = jnp.abs(d)
    # torch SmoothL1: 0.5*d^2/beta if |d| < beta else |d| - 0.5*beta
    loss = jnp.where(ad < beta, d * d * hob, ad - 0.5 * beta)

    c = cat_ref[i]
    acc_ref[c] = acc_ref[c] + loss * scale  # zero pads contribute exactly 0

    @pl.when(i == pl.num_programs(0) - 1)
    def _finalize():
        for cc in range(num_cats):
            out_ref[cc] = jnp.sum(acc_ref[cc])


def fused_smooth_l1(preds, gts, betas, cats, *, num_cats=3, tile_r=1024):
    """Per-category sums of mean-SmoothL1 losses over (pred, gt) head pairs."""
    assert len(preds) == len(gts) == len(betas) == len(cats) and len(preds) > 0
    for b in betas:
        assert float(b) > 0.0, "SmoothL1 beta must be > 0"

    # Adaptive tile size: never larger than the biggest head needs, capped at
    # `tile_r` rows (1024 rows * 128 lanes * 4 B = 512 KiB per buffer).
    max_rows = max(-(-int(p.size) // 128) for p in preds)
    tile_rows = max(8, min(int(tile_r), _round_up(max_rows, 8)))

    pred_blocks, gt_blocks = [], []
    t_cat, t_scale, t_beta, t_hob = [], [], [], []
    for p, g, b, c in zip(preds, gts, betas, cats):
        assert p.shape == g.shape, (p.shape, g.shape)
        n = int(p.size)
        padded = _round_up(n, tile_rows * 128)
        pf = jnp.pad(p.astype(jnp.float32).reshape(-1), (0, padded - n))
        gf = jnp.pad(g.astype(jnp.float32).reshape(-1), (0, padded - n))
        rows = padded // 128
        pred_blocks.append(pf.reshape(rows, 128))
        gt_blocks.append(gf.reshape(rows, 128))
        n_tiles_h = rows // tile_rows
        t_cat += [int(c)] * n_tiles_h
        t_scale += [1.0 / float(n)] * n_tiles_h
        t_beta += [float(b)] * n_tiles_h
        t_hob += [0.5 / float(b)] * n_tiles_h

    pred_all = jnp.concatenate(pred_blocks, axis=0)
    gt_all = jnp.concatenate(gt_blocks, axis=0)
    cat_arr = jnp.asarray(t_cat, jnp.int32)
    scale_arr = jnp.asarray(t_scale, jnp.float32)
    beta_arr = jnp.asarray(t_beta, jnp.float32)
    hob_arr = jnp.asarray(t_hob, jnp.float32)
    n_tiles = int(cat_arr.shape[0])

    kernel = functools.partial(_fused_smooth_l1_kernel, num_cats=num_cats)
    grid_spec = pltpu.PrefetchScalarGridSpec(
        num_scalar_prefetch=4,
        grid=(n_tiles,),
        in_specs=[
            pl.BlockSpec((tile_rows, 128), lambda i, *_: (i, 0)),
            pl.BlockSpec((tile_rows, 128), lambda i, *_: (i, 0)),
        ],
        out_specs=pl.BlockSpec(memory_space=pltpu.MemorySpace.SMEM),
        scratch_shapes=[pltpu.VMEM((num_cats, tile_rows, 128), jnp.float32)],
    )
    out = pl.pallas_call(
        kernel,
        out_shape=jax.ShapeDtypeStruct((num_cats,), jnp.float32),
        grid_spec=grid_spec,
        compiler_params=pltpu.CompilerParams(
            dimension_semantics=("arbitrary",),
            vmem_limit_bytes=32 * 1024 * 1024,
        ),
    )(cat_arr, scale_arr, beta_arr, hob_arr, pred_all, gt_all)
    return out  # shape (num_cats,): [pose_sum, trans_sum, aux_sum]


# ----------------------------------------------------------------------------
# Glue: 6D rotation representation (first two rows of each 3x3 rot matrix)
# ----------------------------------------------------------------------------
def rot_mat2r6d(rot):
    # rot: [B, S, J, 3, 3] -> [B, S, J*6]
    B, S, J = rot.shape[:3]
    return rot[..., :2, :].reshape(B, S, J * 6)


def _take_channels(x, inds):
    """Channel select; uses a static slice when `inds` is contiguous."""
    inds = list(inds)
    if inds == list(range(inds[0], inds[0] + len(inds))):
        return x[:, :, inds[0]:inds[0] + len(inds)]
    return x[:, :, jnp.array(inds)]


# ----------------------------------------------------------------------------
# MotionLoss (forward-pass semantics of the PyTorch module)
# ----------------------------------------------------------------------------
class MotionLoss:
    # category ids for the fused kernel
    _POSE, _TRANS, _AUX = 0, 1, 2

    def __init__(self, configs: dict) -> None:
        self.configs = configs
        self.pose_beta = configs["loss"]["pose_beta"]
        self.trans_beta = configs["loss"]["trans_beta"]
        self.aux_beta = configs["loss"]["aux_beta"]
        self.trans_weight = configs["loss"]["trans_weight"]
        self.aux_weight = configs["loss"]["aux_weight"]

    def __call__(self, predicts: dict, targets: dict):
        preds, gts, betas, cats = [], [], [], []
        for key, val in predicts.items():
            inds = self.configs["loss"][key]["indexs"]
            tars = self.configs["loss"][key]["target"]
            if tars == "grot":
                gt = _take_channels(rot_mat2r6d(targets[tars]), inds)
            elif tars == "trans":
                gt = targets[tars]
            else:
                gt = _take_channels(targets[tars], inds)
            if "out_rot" in key:
                cat, beta = self._POSE, self.pose_beta
            elif "out_trans" in key:
                cat, beta = self._TRANS, self.trans_beta
            else:
                cat, beta = self._AUX, self.aux_beta
            preds.append(val)
            gts.append(gt)
            betas.append(beta)
            cats.append(cat)

        sums = fused_smooth_l1(preds, gts, betas, cats, num_cats=3)
        pose_loss, trans_loss, aux_loss = sums[0], sums[1], sums[2]
        main_loss = (
            pose_loss + self.trans_weight * trans_loss + self.aux_weight * aux_loss
        )
        return (
            main_loss,
            pose_loss,
            trans_loss * self.trans_weight,
            aux_loss * self.aux_weight,
        )


# ----------------------------------------------------------------------------
# Pure-JAX reference (for sanity checking the kernel)
# ----------------------------------------------------------------------------
def _smooth_l1_mean_ref(p, g, beta):
    d = p.astype(jnp.float32) - g.astype(jnp.float32)
    ad = jnp.abs(d)
    return jnp.mean(jnp.where(ad < beta, 0.5 * d * d / beta, ad - 0.5 * beta))


# ----------------------------------------------------------------------------
# Example run
# ----------------------------------------------------------------------------
if __name__ == "__main__":
    B, S, J = 2, 8, 4  # batch, sequence length, number of joints

    configs = {
        "loss": {
            "pose_beta": 0.01,
            "trans_beta": 0.05,
            "aux_beta": 0.01,
            "trans_weight": 0.1,
            "aux_weight": 0.1,
            # per-prediction-head configs
            "out_rot": {"indexs": list(range(12)), "target": "grot"},   # 2 joints * 6D
            "out_trans": {"indexs": [0, 1, 2], "target": "trans"},
            "out_vel": {"indexs": [0, 1, 2, 3, 4, 5], "target": "vel"},  # aux head
        }
    }

    key = jax.random.PRNGKey(0)
    k1, k2, k3, k4, k5, k6 = jax.random.split(key, 6)

    targets = {
        "grot": jax.random.normal(k1, (B, S, J, 3, 3), jnp.float32),
        "trans": jax.random.normal(k2, (B, S, 3), jnp.float32),
        "vel": jax.random.normal(k3, (B, S, 12), jnp.float32),
    }
    predicts = {
        "out_rot": jax.random.normal(k4, (B, S, 12), jnp.float32),
        "out_trans": jax.random.normal(k5, (B, S, 3), jnp.float32),
        "out_vel": jax.random.normal(k6, (B, S, 6), jnp.float32),
    }

    criterion = MotionLoss(configs)
    main_loss, pose_loss, trans_loss_w, aux_loss_w = jax.block_until_ready(
        criterion(predicts, targets)
    )

    # sanity: all finite scalars
    for v in (main_loss, pose_loss, trans_loss_w, aux_loss_w):
        assert v.shape == () and bool(jnp.isfinite(v))

    # sanity: matches pure-JAX SmoothL1-mean reference
    ref_pose = _smooth_l1_mean_ref(
        predicts["out_rot"], rot_mat2r6d(targets["grot"])[:, :, :12], 0.01
    )
    ref_trans = _smooth_l1_mean_ref(predicts["out_trans"], targets["trans"], 0.05)
    ref_aux = _smooth_l1_mean_ref(predicts["out_vel"], targets["vel"][:, :, :6], 0.01)
    ref_main = ref_pose + 0.1 * ref_trans + 0.1 * ref_aux
    assert jnp.allclose(pose_loss, ref_pose, rtol=1e-5, atol=1e-5)
    assert jnp.allclose(trans_loss_w, 0.1 * ref_trans, rtol=1e-5, atol=1e-5)
    assert jnp.allclose(aux_loss_w, 0.1 * ref_aux, rtol=1e-5, atol=1e-5)
    assert jnp.allclose(main_loss, ref_main, rtol=1e-5, atol=1e-5)

    print("KERNEL_OK")
</pallas_src>

<mosaic_0001>
module attributes {stable_mosaic.version = 11 : i64} {
  func.func @_fused_smooth_l1_kernel(%arg0: i32, %arg1: memref<3xi32, #tpu.memory_space<smem>>, %arg2: memref<3xf32, #tpu.memory_space<smem>>, %arg3: memref<3xf32, #tpu.memory_space<smem>>, %arg4: memref<3xf32, #tpu.memory_space<smem>>, %arg5: memref<8x128xf32, #tpu.memory_space<vmem>>, %arg6: memref<8x128xf32, #tpu.memory_space<vmem>>, %arg7: memref<3xf32, #tpu.memory_space<smem>>, %arg8: memref<3x8x128xf32, #tpu.memory_space<vmem>>) attributes {dimension_semantics = [#tpu.dimension_semantics<arbitrary>], iteration_bounds = array<i64: 3>, scalar_prefetch = 4 : i64, scratch_operands = 1 : i64, tpu.core_type = #tpu.core_type<tc>, window_params = [{transform_indices = @transform_0, window_bounds = array<i64: 8, 128>}, {transform_indices = @transform_1, window_bounds = array<i64: 8, 128>}, {transform_indices = @transform_2, window_bounds = array<i64: 3>}]} {
    %c0_i32 = arith.constant 0 : i32
    %0 = arith.cmpi eq, %arg0, %c0_i32 : i32
    %1 = arith.extui %0 : i1 to i32
    %c0_i32_0 = arith.constant 0 : i32
    %2 = arith.cmpi ne, %1, %c0_i32_0 : i32
    scf.if %2 {
      %cst_9 = arith.constant 0.000000e+00 : f32
      %37 = vector.broadcast %cst_9 : f32 to vector<3x8x128xf32>
      %c0_10 = arith.constant 0 : index
      %c0_11 = arith.constant 0 : index
      %c0_12 = arith.constant 0 : index
      %38 = vector.load %arg8[%c0_10, %c0_11, %c0_12] : memref<3x8x128xf32, #tpu.memory_space<vmem>>, vector<3x8x128xf32>
      tpu.vector_store %arg8[%c0_10, %c0_11, %c0_12], %37 {strides = array<i32>} : memref<3x8x128xf32, #tpu.memory_space<vmem>>, vector<3x8x128xf32>,
    } else {
    }
    %3 = arith.index_cast %arg0 : i32 to index
    %4 = memref.load %arg3[%3] : memref<3xf32, #tpu.memory_space<smem>>
    %5 = arith.index_cast %arg0 : i32 to index
    %6 = memref.load %arg4[%5] : memref<3xf32, #tpu.memory_space<smem>>
    %7 = arith.index_cast %arg0 : i32 to index
    %8 = memref.load %arg2[%7] : memref<3xf32, #tpu.memory_space<smem>>
    %c0 = arith.constant 0 : index
    %c0_1 = arith.constant 0 : index
    %9 = vector.load %arg5[%c0, %c0_1] : memref<8x128xf32, #tpu.memory_space<vmem>>, vector<8x128xf32>
    %c0_2 = arith.constant 0 : index
    %c0_3 = arith.constant 0 : index
    %10 = vector.load %arg6[%c0_2, %c0_3] : memref<8x128xf32, #tpu.memory_space<vmem>>, vector<8x128xf32>
    %11 = arith.subf %9, %10 : vector<8x128xf32>
    %12 = math.absf %11 : vector<8x128xf32>
    %13 = vector.broadcast %4 : f32 to vector<8x128xf32>
    %14 = arith.cmpf olt, %12, %13 : vector<8x128xf32>
    %15 = arith.mulf %11, %11 : vector<8x128xf32>
    %16 = vector.broadcast %6 : f32 to vector<8x128xf32>
    %17 = arith.mulf %15, %16 : vector<8x128xf32>
    %cst = arith.constant 5.000000e-01 : f32
    %18 = arith.mulf %cst, %4 : f32
    %19 = vector.broadcast %18 : f32 to vector<8x128xf32>
    %20 = arith.subf %12, %19 : vector<8x128xf32>
    %21 = arith.select %14, %17, %20 : vector<8x128xi1>, vector<8x128xf32>
    %22 = arith.index_cast %arg0 : i32 to index
    %23 = memref.load %arg1[%22] : memref<3xi32, #tpu.memory_space<smem>>
    %24 = arith.index_cast %23 : i32 to index
    %c0_4 = arith.constant 0 : index
    %c0_5 = arith.constant 0 : index
    %25 = vector.load %arg8[%24, %c0_4, %c0_5] : memref<3x8x128xf32, #tpu.memory_space<vmem>>, vector<1x8x128xf32>
    %26 = vector.shape_cast %25 : vector<1x8x128xf32> to vector<8x128xf32>
    %27 = vector.broadcast %8 : f32 to vector<8x128xf32>
    %28 = arith.mulf %21, %27 : vector<8x128xf32>
    %29 = arith.addf %26, %28 : vector<8x128xf32>
    %30 = arith.index_cast %23 : i32 to index
    %c0_6 = arith.constant 0 : index
    %c0_7 = arith.constant 0 : index
    %31 = vector.load %arg8[%30, %c0_6, %c0_7] : memref<3x8x128xf32, #tpu.memory_space<vmem>>, vector<1x8x128xf32>
    %32 = vector.shape_cast %31 : vector<1x8x128xf32> to vector<8x128xf32>
    %33 = vector.shape_cast %29 : vector<8x128xf32> to vector<1x8x128xf32>
    tpu.vector_store %arg8[%30, %c0_6, %c0_7], %33 {strides = array<i32>} : memref<3x8x128xf32, #tpu.memory_space<vmem>>, vector<1x8x128xf32>,
    %c2_i32 = arith.constant 2 : i32
    %34 = arith.cmpi eq, %arg0, %c2_i32 : i32
    %35 = arith.extui %34 : i1 to i32
    %c0_i32_8 = arith.constant 0 : i32
    %36 = arith.cmpi ne, %35, %c0_i32_8 : i32
    scf.if %36 {
      %c0_9 = arith.constant 0 : index
      %c0_10 = arith.constant 0 : index
      %c0_11 = arith.constant 0 : index
      %37 = vector.load %arg8[%c0_9, %c0_10, %c0_11] : memref<3x8x128xf32, #tpu.memory_space<vmem>>, vector<1x8x128xf32>
      %38 = vector.shape_cast %37 : vector<1x8x128xf32> to vector<8x128xf32>
      %39 = vector.shape_cast %38 : vector<8x128xf32> to vector<1x8x128xf32>
      %cst_12 = arith.constant dense<0.000000e+00> : vector<1xf32>
      %40 = vector.multi_reduction <add>, %39, %cst_12 [1, 2] : vector<1x8x128xf32> to vector<1xf32>
      %41 = vector.shape_cast %40 : vector<1xf32> to vector<1x1x1xf32>
      %42 = vector.extract %41[0, 0, 0] : f32 from vector<1x1x1xf32>
      %c0_13 = arith.constant 0 : index
      %43 = memref.load %arg7[%c0_13] : memref<3xf32, #tpu.memory_space<smem>>
      memref.store %42, %arg7[%c0_13] : memref<3xf32, #tpu.memory_space<smem>>
      %c1 = arith.constant 1 : index
      %c0_14 = arith.constant 0 : index
      %c0_15 = arith.constant 0 : index
      %44 = vector.load %arg8[%c1, %c0_14, %c0_15] : memref<3x8x128xf32, #tpu.memory_space<vmem>>, vector<1x8x128xf32>
      %45 = vector.shape_cast %44 : vector<1x8x128xf32> to vector<8x128xf32>
      %46 = vector.shape_cast %45 : vector<8x128xf32> to vector<1x8x128xf32>
      %cst_16 = arith.constant dense<0.000000e+00> : vector<1xf32>
      %47 = vector.multi_reduction <add>, %46, %cst_16 [1, 2] : vector<1x8x128xf32> to vector<1xf32>
      %48 = vector.shape_cast %47 : vector<1xf32> to vector<1x1x1xf32>
      %49 = vector.extract %48[0, 0, 0] : f32 from vector<1x1x1xf32>
      %c1_17 = arith.constant 1 : index
      %50 = memref.load %arg7[%c1_17] : memref<3xf32, #tpu.memory_space<smem>>
      memref.store %49, %arg7[%c1_17] : memref<3xf32, #tpu.memory_space<smem>>
      %c2 = arith.constant 2 : index
      %c0_18 = arith.constant 0 : index
      %c0_19 = arith.constant 0 : index
      %51 = vector.load %arg8[%c2, %c0_18, %c0_19] : memref<3x8x128xf32, #tpu.memory_space<vmem>>, vector<1x8x128xf32>
      %52 = vector.shape_cast %51 : vector<1x8x128xf32> to vector<8x128xf32>
      %53 = vector.shape_cast %52 : vector<8x128xf32> to vector<1x8x128xf32>
      %cst_20 = arith.constant dense<0.000000e+00> : vector<1xf32>
      %54 = vector.multi_reduction <add>, %53, %cst_20 [1, 2] : vector<1x8x128xf32> to vector<1xf32>
      %55 = vector.shape_cast %54 : vector<1xf32> to vector<1x1x1xf32>
      %56 = vector.extract %55[0, 0, 0] : f32 from vector<1x1x1xf32>
      %c2_21 = arith.constant 2 : index
      %57 = memref.load %arg7[%c2_21] : memref<3xf32, #tpu.memory_space<smem>>
      memref.store %56, %arg7[%c2_21] : memref<3xf32, #tpu.memory_space<smem>>
    } else {
    }
    return
  }
  func.func @transform_0(%arg0: i32, %arg1: memref<3xi32, #tpu.memory_space<smem>>, %arg2: memref<3xf32, #tpu.memory_space<smem>>, %arg3: memref<3xf32, #tpu.memory_space<smem>>, %arg4: memref<3xf32, #tpu.memory_space<smem>>) -> (i32, i32) {
    %c0_i32 = arith.constant 0 : i32
    %c0_i32_0 = arith.constant 0 : i32
    return %arg0, %c0_i32 : i32, i32
  }
  func.func @transform_1(%arg0: i32, %arg1: memref<3xi32, #tpu.memory_space<smem>>, %arg2: memref<3xf32, #tpu.memory_space<smem>>, %arg3: memref<3xf32, #tpu.memory_space<smem>>, %arg4: memref<3xf32, #tpu.memory_space<smem>>) -> (i32, i32) {
    %c0_i32 = arith.constant 0 : i32
    %c0_i32_0 = arith.constant 0 : i32
    return %arg0, %c0_i32 : i32, i32
  }
  func.func @transform_2(%arg0: i32, %arg1: memref<3xi32, #tpu.memory_space<smem>>, %arg2: memref<3xf32, #tpu.memory_space<smem>>, %arg3: memref<3xf32, #tpu.memory_space<smem>>, %arg4: memref<3xf32, #tpu.memory_space<smem>>) -> i32 {
    %c0_i32 = arith.constant 0 : i32
    %c0_i32_0 = arith.constant 0 : i32
    return %c0_i32 : i32
  }
}

</mosaic_0001>

<bundles_post_ra>
// kernel: tpu_custom_call.1
= control target key start
LH: loop header
LB: loop body
LE: loop exit
PB: predicated region body
PF: predicated region fallthrough
CT: control target
= control target key end

     0   :  { %s618_s27 = smov [#allocation4]   ;;  %s619_s28 = smov [#allocation5]   ;;  %s802_s0 = inlined_call_operand.hbm [shape: s32[3], index: 0, kind: input, shape index: {}]   ;;  %s803_s4 = inlined_call_operand.hbm [shape: f32[24,128], index: 4, kind: input, shape index: {}]   ;;  %s804_s5 = inlined_call_operand.hbm [shape: f32[24,128], index: 5, kind: input, shape index: {}]   ;;  %s805_s6 = inlined_call_operand.hbm [shape: f32[3], index: 6, kind: output, shape index: {}]   ;;  %s806_s1 = inlined_call_operand.hbm [shape: f32[3], index: 1, kind: input, shape index: {}]   ;;  %s807_s2 = inlined_call_operand.vmem [shape: f32[3], index: 2, kind: input, shape index: {}]   ;;  %s808_s3 = inlined_call_operand.vmem [shape: f32[3], index: 3, kind: input, shape index: {}]  }
   0x1   :  { %s12_s23 = sshll.u32 %s802_s0, 4  ;;  %s17_s26 = sshll.u32 %s806_s1, 4  ;;  %s13_s23 = int_to_ptr.hbm [resolvable:$true] %s12_s23  ;;  %s18_s26 = int_to_ptr.hbm [resolvable:$true] %s17_s26 }
   0x2   :  { %15 = dma.hbm_to_smem %s13_s23, 16, %s618_s27, [#allocation3] }
   0x3   :  { %20 = dma.hbm_to_smem %s18_s26, 16, %s619_s28, [#allocation3] }
   0x4   :  { %s22_s7 = sshll.u32 %s807_s2, 4  ;;  %s27_s10 = sshll.u32 %s808_s3, 4  ;;  %s23_s7 = int_to_ptr.vmem [resolvable:$true] %s22_s7  ;;  %s28_s10 = int_to_ptr.vmem [resolvable:$true] %s27_s10 }
   0x5   :  { %s620_s0 = smov [#allocation6]   ;;  %s621_s11 = smov [#allocation7]  }
   0x6   :  { %25 = dma.vmem_to_smem %s23_s7, 16, %s620_s0, [#allocation3] }
   0x7   :  { %30 = dma.vmem_to_smem %s28_s10, 16, %s621_s11, [#allocation3] }
   0x8   :  { %588 = dma.done.wait [#allocation3], 64 }
   0x9   :  { %589 = vsyncadd [#allocation3], 4294967232 }
   0xa   :  { %33 = sfence }
   0xb   :  { %34 = vsyncpa [#allocation9], 0 }
   0xc   :  { %36 = vsyncpa [#allocation9 + $0x1], 0 }
   0xd   :  { %37 = vsyncpa [#allocation12], 0 }
   0xe   :  { %39 = vsyncpa [#allocation12 + $0x1], 0 }
   0xf   :  { %40 = vsyncpa [#allocation10], 0  ;;  %s671_s1 = smov 0   ;;  %s673_s2 = smov 0  }
  0x10   :  { %s675_s12 = smov 0   ;;  %s677_s3 = smov 0  }
  0x11 LB: > { %s690_s13 = sadd.s32 4294967295, %s616_s3   ;;  %s693_s14 = sadd.s32 1, %s616_s3   ;;  %s616_s3 = sphi %s677_s3, %s816_s3   ;;  %s612_s12 = sphi %s675_s12, %s815_s12   ;;  %s608_s2 = sphi %s673_s2, %s814_s2   ;;  %s604_s1 = sphi %s671_s1, %s813_s1  }
  0x12   : > { %s50_s15 = ssub.s32 %s616_s3, %s693_s14  ;;  %s53_s16 = sadd.s32 1, %s612_s12 }
  0x13   : > { %p51_p0 = scmp.eq.s32.totalorder %s50_s15, 0  ;;  %p60_p1 = scmp.ne.s32.totalorder %s612_s12, %s608_s2 }
  0x14   : > { %p61_p2 = scmp.eq.s32.totalorder %s616_s3, 0  ;;  %p66_p3 = scmp.ne.s32.totalorder %s608_s2, %s604_s1 }
  0x15   : > { %s703_s17 = scalar_select %p51_p0, %s612_s12, %s53_s16  }
  0x16   : > { %p705_p4 = por %p61_p2, %p60_p1  ;;  %p67_p5 = scmp.eq.s32.totalorder %s690_s13, 0 }
  0x17   : > { %p409_p6 = scmp.lt.s32.totalorder %s616_s3, 3  ;;  %s716_s20 = sand.u32 1, %s612_s12  }
  0x18   : > { %p711_p7 = por %p67_p5, %p66_p3  ;;  %s374_s21 = sshll.u32 %s716_s20, 3 }
  0x19   : > { %s375_s22 = sshll.u32 %s616_s3, 3  ;;  %s141_s26 = scalar_lea.vmem [#allocation8], %s374_s21 }
  0x1a   : > { %s145_s25 = scalar_lea.hbm %s803_s4, %s375_s22  ;;  %s149_s27 = sshll.u32 %s141_s26, 4  ;;  %s150_s27 = int_to_ptr.vmem [resolvable:$true] %s149_s27 }
  0x1b   : > { %s147_s28 = sshll.u32 %s145_s25, 4  ;;  %p725_p8 = pnand %p409_p6, %p705_p4  ;;  %s148_s28 = int_to_ptr.hbm [resolvable:$true] %s147_s28 }
  0x1c   : > { %p378_p9 = scmp.ge.s32.totalorder %s616_s3, 1  ;;  %p173_p10 = scmp.lt.s32.totalorder %s616_s3, 4 }
  0x1d   : > { %s138_s30 = scalar_lea.sflag [#allocation9], %s716_s20  ;;  %s498_s7 = sshra.s32 %s148_s28, 4  ;;  %s499_s7 = int_to_ptr.hbm [resolvable:$true] %s498_s7 }
  0x1e   : > { %s500_s8 = scalar_lea.hbm %s499_s7, 8  ;;  %p502_p12 = pneg %p725_p8 }
  0x1f   : > { %p501_p11 = scmp.ne.s32.totalorder %s499_s7, %s500_s8  ;;  %s505_s0 = scalar_lea.hbm %s803_s4, 24 }
  0x20   : > { %p506_p1 = scmp.lt.s32.totalorder %s499_s7, %s803_s4  ;;  %p507_p2 = scmp.lt.s32.totalorder %s505_s0, %s500_s8 }
  0x21   : > { %p503_p13 = pnand %p502_p12, %p501_p11 }
  0x22   : > { %p508_p3 = por %p507_p2, %p506_p1 }
  0x23   : > { %p504_p0 = pneg %p503_p13 }
  0x25   : > { %p509_p4 = pnand %p508_p3, %p504_p0 }
  0x27   : > { %512 = shalt.err (!%p509_p4)
}
  0x28   : > { %405 = dma.hbm_to_vmem [thread:$0]  (!%p725_p8), %s148_s28, 128, %s150_s27, %s138_s30  }
  0x29   : > { %p749_p5 = pnand %p378_p9, %p173_p10  ;;  %s164_s23 = scalar_lea.hbm %s804_s5, %s375_s22 }
  0x2a   : > { %s160_s24 = scalar_lea.vmem [#allocation11], %s374_s21  ;;  %s166_s26 = sshll.u32 %s164_s23, 4  ;;  %s167_s26 = int_to_ptr.hbm [resolvable:$true] %s166_s26 }
  0x2b   : > { %s168_s25 = sshll.u32 %s160_s24, 4  ;;  %s157_s7 = scalar_lea.sflag [#allocation12], %s716_s20  ;;  %s169_s25 = int_to_ptr.vmem [resolvable:$true] %s168_s25 }
  0x2c   : > { %s528_s8 = sshra.s32 %s167_s26, 4  ;;  %s535_s28 = scalar_lea.hbm %s804_s5, 24  ;;  %s529_s8 = int_to_ptr.hbm [resolvable:$true] %s528_s8 }
  0x2d   : > { %s530_s9 = scalar_lea.hbm %s529_s8, 8  ;;  %p536_p11 = scmp.lt.s32.totalorder %s529_s8, %s804_s5 }
  0x2e   : > { %p531_p6 = scmp.ne.s32.totalorder %s529_s8, %s530_s9  ;;  %p537_p13 = scmp.lt.s32.totalorder %s535_s28, %s530_s9 }
  0x30   : > { %p533_p9 = pnand %p531_p6, %p502_p12  ;;  %p538_p0 = por %p537_p13, %p536_p11 }
  0x32   : > { %p534_p10 = pneg %p533_p9 }
  0x34   : > { %p539_p1 = pnand %p538_p0, %p534_p10 }
  0x36   : > { %542 = shalt.err (!%p539_p1)
}
  0x37   : > { %408 = dma.hbm_to_vmem [thread:$0]  (!%p725_p8), %s167_s26, 128, %s169_s25, %s157_s7  }
  0x38   : > { %177 = sbr.rel (%p749_p5) target bundleno = 293 (0x125), region = 28  ;;  %s179_s20 = sand.u32 (!%p749_p5), 1, %s608_s2  }
  0x39   : > { %s379_s21 = sshll.u32 (!%p749_p5), %s179_s20, 3  ;;  %s180_s10 = scalar_lea.sflag (!%p749_p5), [#allocation9], %s179_s20 }
  0x3a   : > { %s183_s0 = scalar_lea.vmem (!%p749_p5), [#allocation8], %s379_s21 }
  0x3d   : > { %591 = dma.done.wait (%p711_p7), %s180_s10, 128  }
  0x3e   : > { %593 = vsyncadd (%p711_p7), %s180_s10, 4294967168  ;;  %s190_s11 = scalar_lea.sflag [#allocation12], %s179_s20  ;;  %s193_s1 = scalar_lea.vmem [#allocation11], %s379_s21 }
  0x3f   : > { %595 = dma.done.wait (%p711_p7), %s190_s11, 128  }
  0x40   : > { %597 = vsyncadd (%p711_p7), %s190_s11, 4294967168  ;;  %p381_p8 = scmp.ne.s32.totalorder %s690_s13, 0 }
  0x42   : > { %218 = sbr.rel (%p381_p8) target bundleno = 75 (0x4b), region = 40 }
  0x47   : > { %v622_v0 = vmov 0.0  }
  0x48   : > { %219 = vst [vmem:[#allocation2] sm:$0xff] %v622_v0 }
  0x49   : > { %220 = vst [vmem:[#allocation2 + $0x8] sm:$0xff] %v622_v0 }
  0x4a   : > { %221 = vst [vmem:[#allocation2 + $0x10] sm:$0xff] %v622_v0 }
  0x4b PF: > { %s222_s29 = sld [smem:[#allocation6 + %s690_s13]]  ;;  %v225_v1 = vld [vmem:[%s183_s0] sm:$0xff]  ;;  %v226_v2 = vld [vmem:[%s193_s1] sm:$0xff]  ;;  %p383_p7 = scmp.ne.s32.totalorder %s690_s13, 2 }
  0x4c   : > { %s223_s15 = sld [smem:[#allocation7 + %s690_s13]]  ;;  %v227_v3 = vsub.f32 %v225_v1, %v226_v2 }
  0x4d   : > { %s224_s16 = sld [smem:[#allocation5 + %s690_s13]] }
  0x4e   : > { %s238_s19 = sld [smem:[#allocation4 + %s690_s13]]  ;;  %v228_v4 = vand.u32 2147483647, %v227_v3  ;;  %v231_v5 = vmul.f32 %v227_v3, %v227_v3 }
  0x51   : > { %v229_v6 = vstv %s222_s29  ;;  %s234_s18 = smul.f32 0.5, %s222_s29 }
  0x52   : > { %v232_v7 = vstv %s223_s15  ;;  %vm230_vm0 = vcmp.lt.f32.partialorder %v228_v4, %v229_v6 }
  0x53   : > { %v233_v8 = vmul.f32 %v232_v7, %v231_v5  ;;  %v235_v9 = vstv %s234_s18  ;;  %v242_v11 = vstv %s224_s16 }
  0x54   : > { %v236_v10 = vsub.f32 %v228_v4, %v235_v9  ;;  %s382_s23 = sshll.u32 %s238_s19, 3 }
  0x55   : > { %s240_s24 = scalar_lea.vmem [#allocation2], %s382_s23 }
  0x56   : > { %v237_v12 = vsel %vm230_vm0, %v233_v8, %v236_v10  ;;  %v241_v13 = vld [vmem:[%s240_s24] sm:$0xff] }
  0x57   : > { %v243_v14 = vmul.f32 %v242_v11, %v237_v12  ;;  %249 = sbr.rel (%p383_p7) target bundleno = 287 (0x11f), region = 44 }
  0x59   : > { %v244_v15 = vadd.f32 %v243_v14, %v241_v13 }
  0x5b   : > { %245 = vst [vmem:[%s240_s24] sm:$0xff] %v244_v15 }
  0x62   : > { %v250_v16 = vld [vmem:[#allocation2] sm:$0xff]  ;;  %v276_v17 = vld [vmem:[#allocation2 + $0x10] sm:$0xff]  ;;  %v263_v18 = vld [vmem:[#allocation2 + $0x8] sm:$0xff] }
  0x63   : > { %251 = vadd.xlane.f32.xlu0 %v250_v16  ;;  %277 = vadd.xlane.f32.xlu1 %v276_v17 }
  0x6b   : > { %264 = vadd.xlane.f32.xlu0 %v263_v18 }
  0xd6   : > { %v252_v19 = vpop.xlane.xlu0 %251  ;;  %v278_v20 = vpop.xlane.xlu1 %277 }
  0xd7   : > { %v253_v21 = vrot.slane %v252_v19, 4  ;;  %v279_v22 = vrot.slane %v278_v20, 4 }
  0xd9   : > { %v254_v23 = vadd.f32 %v253_v21, %v252_v19  ;;  %v280_v24 = vadd.f32 %v279_v22, %v278_v20 }
  0xdb   : > { %v255_v25 = vrot.slane %v254_v23, 2  ;;  %v281_v27 = vrot.slane %v280_v24, 2 }
  0xdd   : > { %v256_v26 = vadd.f32 %v255_v25, %v254_v23  ;;  %v282_v33 = vadd.f32 %v281_v27, %v280_v24 }
  0xde   : > { %v265_v28 = vpop.xlane.xlu0 %264 }
  0xdf   : > { %v266_v29 = vrot.slane %v265_v28, 4  ;;  %v257_v30 = vrot.slane %v256_v26, 1  ;;  %v283_v36 = vrot.slane %v282_v33, 1 }
  0xe1   : > { %v267_v31 = vadd.f32 %v266_v29, %v265_v28  ;;  %v258_v32 = vadd.f32 %v257_v30, %v256_v26  ;;  %v284_v39 = vadd.f32 %v283_v36, %v282_v33 }
  0xe3   : > { %v268_v34 = vrot.slane %v267_v31, 2  ;;  %388 = vpush %v258_v32 }
  0xe5   : > { %v269_v35 = vadd.f32 %v268_v34, %v267_v31 }
  0xe7   : > { %v270_v37 = vrot.slane %v269_v35, 1 }
  0xe9   : > { %v271_v38 = vadd.f32 %v270_v37, %v269_v35 }
  0xeb   : > { %390 = vpush %v271_v38 }
  0xec   : > { %392 = vpush %v284_v39 }
 0x114   : > { %s389_s25 = spop %388 }
 0x115   : > { %261 = sst [smem:[#allocation13]] %s389_s25 }
 0x11c   : > { %s391_s26 = spop %390 }
 0x11d   : > { %274 = sst [smem:[#allocation13 + $0x1]] %s391_s26  ;;  %s393_s7 = spop %392 }
 0x11e   : > { %287 = sst [smem:[#allocation13 + $0x2]] %s393_s7 }
 0x11f PF: > { %p410_p12 = scmp.eq.s32.totalorder %s690_s13, 2  ;;  %s294_s3 = sshll.u32 %s805_s6, 4  ;;  %s295_s3 = int_to_ptr.hbm [resolvable:$true] %s294_s3 }
 0x120   : > { %s623_s27 = smov [#allocation13]  }
 0x121   : > { %399 = dma.smem_to_hbm (%p410_p12), %s623_s27, 16, %s295_s3, [#allocation10]  }
 0x122   : > { %599 = dma.done.wait (%p410_p12), [#allocation10], 16  }
 0x123   : > { %601 = vsyncadd (%p410_p12), [#allocation10], 4294967280 }
 0x124   : > { %303 = sfence }
 0x125 PF: > { %p43_p2 = scmp.ge.s32.totalorder %s693_s14, 5   ;;  %s813_s1 = smov %s608_s2 }
 0x126   : > { %s814_s2 = smov %s612_s12  ;;  %s815_s12 = smov %s703_s17 }
 0x127   : > { %s816_s3 = smov %s693_s14  ;;  %45 = sbr.rel (!%p43_p2) target bundleno = 17 (0x11), region = 92 }
 0x12c   :  { %309 = vsyncpa [#allocation9], 1 }
 0x12d   :  { %311 = vsyncpa [#allocation9 + $0x1], 1 }
 0x12e   :  { %312 = vsyncpa [#allocation12], 1 }
 0x12f   :  { %314 = vsyncpa [#allocation12 + $0x1], 1 }
 0x130   :  { %315 = vsyncpa [#allocation10], 1 }
 0x131   :  { %317 = vsyncpa [#allocation10 + $0x1], 1 }

</bundles_post_ra>
